<compile_context>
chip_gen: v7x
topology: tpu7x:2x2x1
jax: 0.10.0
libtpu: 0.0.40
codegen_flags: <defaults>
</compile_context>

<pallas_src>
import functools
import math

import jax
import jax.numpy as jnp
from jax.experimental import pallas as pl
from jax.experimental.pallas import tpu as pltpu


# ----------------------------- Pallas kernel -------------------------------
def _conv_im2col_kernel(x_ref, w_ref, b_ref, o_ref, xw_ref, im_ref, *, K, W, C):
    # x_ref : (1, X_rows, C)   bf16  one image, channels-last flat spatial (+pad)
    # w_ref : (KD_pad, TN)     bf16  fused (kh, kw, c)-major weight slab
    # b_ref : (1, TN)          f32
    # o_ref : (1, TM, TN)      f32   one spatial-row chunk x one channel tile
    # xw_ref: (TM + halo, C)   f32   staged activation row window (scratch)
    # im_ref: (TM, KD_pad)     bf16  persistent im2col chunk (scratch)
    m = pl.program_id(1)          # spatial-row chunk
    j = pl.program_id(2)          # output-channel tile (innermost)
    TM = im_ref.shape[0]
    KD_pad = im_ref.shape[1]
    taps_cols = K * K * C

    # Build the im2col lhs chunk once per (image, row-chunk); it stays resident
    # in VMEM and is reused for every output-channel tile j.
    @pl.when(j == 0)
    def _build_im2col():
        base = pl.multiple_of(m * TM, TM)
        # Stage the haloed row window at an aligned dynamic offset (f32 layout,
        # so the per-tap odd-row slices below are plain 32-bit static slices).
        xw_ref[...] = x_ref[0, pl.ds(base, xw_ref.shape[0]), :].astype(jnp.float32)
        if taps_cols < KD_pad:
            # Zero the padded contraction lanes (they multiply zero weights,
            # but must not hold stale NaN/Inf bits).
            im_ref[:, taps_cols:] = jnp.zeros((TM, KD_pad - taps_cols), jnp.bfloat16)
        for kh in range(K):
            for kw in range(K):
                t = kh * K + kw
                d = kh * W + kw                      # static tap row offset
                im_ref[:, t * C:(t + 1) * C] = xw_ref[d:d + TM, :].astype(jnp.bfloat16)

    # One deep-contraction MXU matmul per grid step, f32 accumulation.
    acc = jnp.dot(im_ref[...], w_ref[...], preferred_element_type=jnp.float32)
    o_ref[0] = acc + b_ref[...]                      # bias exactly once per tile


def _round_up(x, m):
    return (x + m - 1) // m * m


def _mxu_width():
    """128 for v5e-class (and older / unknown) chips, 256 for v6e / v7x."""
    try:
        kind = jax.devices()[0].device_kind.lower()
    except Exception:
        kind = ""
    if "v6" in kind or "v7" in kind or "7x" in kind:
        return 256
    return 128


# ------------------------------- wrapper ------------------------------------
@jax.jit
def my_conv2d_forward(x, weight, bias):
    """Matches myConv2dFunction.forward: conv2d, stride=1, padding=0, NCHW."""
    N, C, H, W = x.shape
    O, _, K, _ = weight.shape
    Ho, Wo = H - K + 1, W - K + 1

    mxu = _mxu_width()
    Mp = Ho * W                                   # pseudo rows per image
    TM = min(mxu, _round_up(Mp, 128))             # spatial-row chunk (128 / 256)
    Mp_pad = _round_up(Mp, TM)
    O_pad = _round_up(O, 128)
    TN = 256 if (mxu == 256 and O_pad % 256 == 0) else 128   # lane-dense channel tile

    KD = K * K * C                                # fused contraction depth
    KD_pad = _round_up(KD, 128)                   # lane-dense lhs / MXU K-dim
    halo = _round_up((K - 1) * (W + 1), 8)        # max tap row offset, rounded
    X_rows = Mp_pad + halo                        # flat rows incl. tail padding

    # Activation: NCHW -> channels-last flat spatial, bf16, tail-row pad.
    x_cl = jnp.transpose(x, (0, 2, 3, 1)).reshape(N, H * W, C).astype(jnp.bfloat16)
    x_cl = jnp.pad(x_cl, ((0, 0), (0, X_rows - H * W), (0, 0)))

    # Weight: (O, C, K, K) -> fused (kh, kw, c)-major (KD_pad, O_pad) bf16 slab.
    w2 = jnp.transpose(weight, (2, 3, 1, 0)).reshape(KD, O)
    w2 = jnp.pad(w2, ((0, KD_pad - KD), (0, O_pad - O))).astype(jnp.bfloat16)

    # Bias: (O,) -> (1, O_pad) f32.
    b2 = jnp.pad(bias.astype(jnp.float32), (0, O_pad - O)).reshape(1, O_pad)

    kernel = functools.partial(_conv_im2col_kernel, K=K, W=W, C=C)
    out_pseudo = pl.pallas_call(
        kernel,
        out_shape=jax.ShapeDtypeStruct((N, Mp_pad, O_pad), jnp.float32),
        grid=(N, Mp_pad // TM, O_pad // TN),
        in_specs=[
            # x depends only on n -> DMA'd once per image, resident across (m, j).
            pl.BlockSpec((1, X_rows, C), lambda n, m, j: (n, 0, 0)),
            pl.BlockSpec((KD_pad, TN), lambda n, m, j: (0, j)),
            pl.BlockSpec((1, TN), lambda n, m, j: (0, j)),
        ],
        out_specs=pl.BlockSpec((1, TM, TN), lambda n, m, j: (n, m, j)),
        scratch_shapes=[
            pltpu.VMEM((TM + halo, C), jnp.float32),      # staged row window
            pltpu.VMEM((TM, KD_pad), jnp.bfloat16),       # im2col lhs chunk
        ],
        compiler_params=pltpu.CompilerParams(
            # j must stay "arbitrary": the im2col scratch built at j == 0 is
            # consumed by all later j of the same (n, m).
            dimension_semantics=("parallel", "parallel", "arbitrary"),
            vmem_limit_bytes=32 * 1024 * 1024,
        ),
    )(x_cl, w2, b2)

    # Drop garbage right-edge columns / padded rows & channels, back to NCHW.
    out = out_pseudo[:, :Mp].reshape(N, Ho, W, O_pad)[:, :, :Wo, :O]
    return jnp.transpose(out, (0, 3, 1, 2)).astype(x.dtype)


# ------------------------- deterministic params ------------------------------
def init_params(key, in_channels, out_channels, kernel_size):
    """Mirrors myConv2d.reset_parameters():
       kaiming_uniform_(a=sqrt(5)) == U(-1/sqrt(fan_in), 1/sqrt(fan_in));
       bias ~ U(-1/sqrt(fan_in), 1/sqrt(fan_in))."""
    kw_key, kb_key = jax.random.split(key)
    fan_in = in_channels * kernel_size * kernel_size
    bound = 1.0 / math.sqrt(fan_in)
    weight = jax.random.uniform(
        kw_key, (out_channels, in_channels, kernel_size, kernel_size),
        dtype=jnp.float32, minval=-bound, maxval=bound)
    bias = jax.random.uniform(
        kb_key, (out_channels,), dtype=jnp.float32, minval=-bound, maxval=bound)
    return weight, bias


# --------------------------------- main --------------------------------------
if __name__ == "__main__":
    key = jax.random.PRNGKey(0)
    k_x, k_p = jax.random.split(key)

    # Small shapes consistent with the module: N=2, C_in=4, H=W=16, C_out=8, K=3
    N, C_in, H, W = 2, 4, 16, 16
    C_out, K = 8, 3

    x = jax.random.normal(k_x, (N, C_in, H, W), dtype=jnp.float32)
    weight, bias = init_params(k_p, C_in, C_out, K)

    out = jax.block_until_ready(my_conv2d_forward(x, weight, bias))

    # Sanity check against XLA's native conv (same semantics as F.conv2d).
    # bf16 MXU operands -> loose-ish tolerance vs the f32 reference.
    ref = jax.lax.conv_general_dilated(
        x, weight, window_strides=(1, 1), padding="VALID",
        dimension_numbers=("NCHW", "OIHW", "NCHW"),
    ) + bias.reshape(1, C_out, 1, 1)

    assert out.shape == (N, C_out, H - K + 1, W - K + 1), out.shape
    assert jnp.allclose(out, ref, atol=5e-2, rtol=5e-2), (
        float(jnp.max(jnp.abs(out - ref))))

    print("KERNEL_OK")
</pallas_src>

<mosaic_0001>
module attributes {stable_mosaic.version = 11 : i64} {
  func.func @_conv_im2col_kernel(%arg0: i32, %arg1: i32, %arg2: i32, %arg3: memref<1x296x4xbf16, #tpu.memory_space<vmem>>, %arg4: memref<128x128xbf16, #tpu.memory_space<vmem>>, %arg5: memref<1x128xf32, #tpu.memory_space<vmem>>, %arg6: memref<1x128x128xf32, #tpu.memory_space<vmem>>, %arg7: memref<168x4xf32, #tpu.memory_space<vmem>>, %arg8: memref<128x128xbf16, #tpu.memory_space<vmem>>) attributes {dimension_semantics = [#tpu.dimension_semantics<parallel>, #tpu.dimension_semantics<parallel>, #tpu.dimension_semantics<arbitrary>], iteration_bounds = array<i64: 2, 2, 1>, scalar_prefetch = 0 : i64, scratch_operands = 2 : i64, tpu.core_type = #tpu.core_type<tc>, window_params = [{transform_indices = @transform_0, window_bounds = array<i64: 1, 296, 4>}, {transform_indices = @transform_1, window_bounds = array<i64: 128, 128>}, {transform_indices = @transform_2, window_bounds = array<i64: 1, 128>}, {transform_indices = @transform_3, window_bounds = array<i64: 1, 128, 128>}]} {
    %c0_i32 = arith.constant 0 : i32
    %0 = arith.cmpi eq, %arg2, %c0_i32 : i32
    %1 = arith.extui %0 : i1 to i32
    %c0_i32_0 = arith.constant 0 : i32
    %2 = arith.cmpi ne, %1, %c0_i32_0 : i32
    scf.if %2 {
      %c128_i32 = arith.constant 128 : i32
      %12 = arith.muli %arg1, %c128_i32 : i32
      %13 = tpu.assume_multiple %12, 128 : i32
      %c0_9 = arith.constant 0 : index
      %14 = arith.index_cast %13 : i32 to index
      %c0_10 = arith.constant 0 : index
      %15 = vector.load %arg3[%c0_9, %14, %c0_10] : memref<1x296x4xbf16, #tpu.memory_space<vmem>>, vector<1x168x4xbf16>
      %16 = vector.shape_cast %15 : vector<1x168x4xbf16> to vector<168x4xbf16>
      %17 = arith.extf %16 : vector<168x4xbf16> to vector<168x4xf32>
      %c0_11 = arith.constant 0 : index
      %c0_12 = arith.constant 0 : index
      %18 = vector.load %arg7[%c0_11, %c0_12] : memref<168x4xf32, #tpu.memory_space<vmem>>, vector<168x4xf32>
      tpu.vector_store %arg7[%c0_11, %c0_12], %17 {strides = array<i32>} : memref<168x4xf32, #tpu.memory_space<vmem>>, vector<168x4xf32>,
      %cst_13 = arith.constant 0.000000e+00 : bf16
      %19 = vector.broadcast %cst_13 : bf16 to vector<128x92xbf16>
      %c0_14 = arith.constant 0 : index
      %c36 = arith.constant 36 : index
      %20 = vector.load %arg8[%c0_14, %c36] : memref<128x128xbf16, #tpu.memory_space<vmem>>, vector<128x92xbf16>
      tpu.vector_store %arg8[%c0_14, %c36], %19 {strides = array<i32>} : memref<128x128xbf16, #tpu.memory_space<vmem>>, vector<128x92xbf16>,
      %c0_15 = arith.constant 0 : index
      %c0_16 = arith.constant 0 : index
      %21 = vector.load %arg7[%c0_15, %c0_16] : memref<168x4xf32, #tpu.memory_space<vmem>>, vector<128x4xf32>
      %22 = arith.truncf %21 : vector<128x4xf32> to vector<128x4xbf16>
      %c0_17 = arith.constant 0 : index
      %c0_18 = arith.constant 0 : index
      %23 = vector.load %arg8[%c0_17, %c0_18] : memref<128x128xbf16, #tpu.memory_space<vmem>>, vector<128x4xbf16>
      tpu.vector_store %arg8[%c0_17, %c0_18], %22 {strides = array<i32>} : memref<128x128xbf16, #tpu.memory_space<vmem>>, vector<128x4xbf16>,
      %c1 = arith.constant 1 : index
      %c0_19 = arith.constant 0 : index
      %24 = vector.load %arg7[%c1, %c0_19] : memref<168x4xf32, #tpu.memory_space<vmem>>, vector<128x4xf32>
      %25 = arith.truncf %24 : vector<128x4xf32> to vector<128x4xbf16>
      %c0_20 = arith.constant 0 : index
      %c4 = arith.constant 4 : index
      %26 = vector.load %arg8[%c0_20, %c4] : memref<128x128xbf16, #tpu.memory_space<vmem>>, vector<128x4xbf16>
      tpu.vector_store %arg8[%c0_20, %c4], %25 {strides = array<i32>} : memref<128x128xbf16, #tpu.memory_space<vmem>>, vector<128x4xbf16>,
      %c2 = arith.constant 2 : index
      %c0_21 = arith.constant 0 : index
      %27 = vector.load %arg7[%c2, %c0_21] : memref<168x4xf32, #tpu.memory_space<vmem>>, vector<128x4xf32>
      %28 = arith.truncf %27 : vector<128x4xf32> to vector<128x4xbf16>
      %c0_22 = arith.constant 0 : index
      %c8 = arith.constant 8 : index
      %29 = vector.load %arg8[%c0_22, %c8] : memref<128x128xbf16, #tpu.memory_space<vmem>>, vector<128x4xbf16>
      tpu.vector_store %arg8[%c0_22, %c8], %28 {strides = array<i32>} : memref<128x128xbf16, #tpu.memory_space<vmem>>, vector<128x4xbf16>,
      %c16 = arith.constant 16 : index
      %c0_23 = arith.constant 0 : index
      %30 = vector.load %arg7[%c16, %c0_23] : memref<168x4xf32, #tpu.memory_space<vmem>>, vector<128x4xf32>
      %31 = arith.truncf %30 : vector<128x4xf32> to vector<128x4xbf16>
      %c0_24 = arith.constant 0 : index
      %c12 = arith.constant 12 : index
      %32 = vector.load %arg8[%c0_24, %c12] : memref<128x128xbf16, #tpu.memory_space<vmem>>, vector<128x4xbf16>
      tpu.vector_store %arg8[%c0_24, %c12], %31 {strides = array<i32>} : memref<128x128xbf16, #tpu.memory_space<vmem>>, vector<128x4xbf16>,
      %c17 = arith.constant 17 : index
      %c0_25 = arith.constant 0 : index
      %33 = vector.load %arg7[%c17, %c0_25] : memref<168x4xf32, #tpu.memory_space<vmem>>, vector<128x4xf32>
      %34 = arith.truncf %33 : vector<128x4xf32> to vector<128x4xbf16>
      %c0_26 = arith.constant 0 : index
      %c16_27 = arith.constant 16 : index
      %35 = vector.load %arg8[%c0_26, %c16_27] : memref<128x128xbf16, #tpu.memory_space<vmem>>, vector<128x4xbf16>
      tpu.vector_store %arg8[%c0_26, %c16_27], %34 {strides = array<i32>} : memref<128x128xbf16, #tpu.memory_space<vmem>>, vector<128x4xbf16>,
      %c18 = arith.constant 18 : index
      %c0_28 = arith.constant 0 : index
      %36 = vector.load %arg7[%c18, %c0_28] : memref<168x4xf32, #tpu.memory_space<vmem>>, vector<128x4xf32>
      %37 = arith.truncf %36 : vector<128x4xf32> to vector<128x4xbf16>
      %c0_29 = arith.constant 0 : index
      %c20 = arith.constant 20 : index
      %38 = vector.load %arg8[%c0_29, %c20] : memref<128x128xbf16, #tpu.memory_space<vmem>>, vector<128x4xbf16>
      tpu.vector_store %arg8[%c0_29, %c20], %37 {strides = array<i32>} : memref<128x128xbf16, #tpu.memory_space<vmem>>, vector<128x4xbf16>,
      %c32 = arith.constant 32 : index
      %c0_30 = arith.constant 0 : index
      %39 = vector.load %arg7[%c32, %c0_30] : memref<168x4xf32, #tpu.memory_space<vmem>>, vector<128x4xf32>
      %40 = arith.truncf %39 : vector<128x4xf32> to vector<128x4xbf16>
      %c0_31 = arith.constant 0 : index
      %c24 = arith.constant 24 : index
      %41 = vector.load %arg8[%c0_31, %c24] : memref<128x128xbf16, #tpu.memory_space<vmem>>, vector<128x4xbf16>
      tpu.vector_store %arg8[%c0_31, %c24], %40 {strides = array<i32>} : memref<128x128xbf16, #tpu.memory_space<vmem>>, vector<128x4xbf16>,
      %c33 = arith.constant 33 : index
      %c0_32 = arith.constant 0 : index
      %42 = vector.load %arg7[%c33, %c0_32] : memref<168x4xf32, #tpu.memory_space<vmem>>, vector<128x4xf32>
      %43 = arith.truncf %42 : vector<128x4xf32> to vector<128x4xbf16>
      %c0_33 = arith.constant 0 : index
      %c28 = arith.constant 28 : index
      %44 = vector.load %arg8[%c0_33, %c28] : memref<128x128xbf16, #tpu.memory_space<vmem>>, vector<128x4xbf16>
      tpu.vector_store %arg8[%c0_33, %c28], %43 {strides = array<i32>} : memref<128x128xbf16, #tpu.memory_space<vmem>>, vector<128x4xbf16>,
      %c34 = arith.constant 34 : index
      %c0_34 = arith.constant 0 : index
      %45 = vector.load %arg7[%c34, %c0_34] : memref<168x4xf32, #tpu.memory_space<vmem>>, vector<128x4xf32>
      %46 = arith.truncf %45 : vector<128x4xf32> to vector<128x4xbf16>
      %c0_35 = arith.constant 0 : index
      %c32_36 = arith.constant 32 : index
      %47 = vector.load %arg8[%c0_35, %c32_36] : memref<128x128xbf16, #tpu.memory_space<vmem>>, vector<128x4xbf16>
      tpu.vector_store %arg8[%c0_35, %c32_36], %46 {strides = array<i32>} : memref<128x128xbf16, #tpu.memory_space<vmem>>, vector<128x4xbf16>,
    } else {
    }
    %c0 = arith.constant 0 : index
    %c0_1 = arith.constant 0 : index
    %3 = vector.load %arg8[%c0, %c0_1] : memref<128x128xbf16, #tpu.memory_space<vmem>>, vector<128x128xbf16>
    %c0_2 = arith.constant 0 : index
    %c0_3 = arith.constant 0 : index
    %4 = vector.load %arg4[%c0_2, %c0_3] : memref<128x128xbf16, #tpu.memory_space<vmem>>, vector<128x128xbf16>
    %cst = arith.constant dense<0.000000e+00> : vector<128x128xf32>
    %5 = tpu.matmul %3, %4, %cst {dimension_numbers = #tpu.dot_dimension_numbers<[1], [0], [0], [1], [0, 0, 1, 1], [], []>} : vector<128x128xbf16>, vector<128x128xbf16>, vector<128x128xf32> -> vector<128x128xf32>
    %c0_4 = arith.constant 0 : index
    %c0_5 = arith.constant 0 : index
    %6 = vector.load %arg5[%c0_4, %c0_5] : memref<1x128xf32, #tpu.memory_space<vmem>>, vector<1x128xf32>
    %7 = vector.broadcast %6 : vector<1x128xf32> to vector<128x128xf32>
    %8 = arith.addf %5, %7 : vector<128x128xf32>
    %c0_6 = arith.constant 0 : index
    %c0_7 = arith.constant 0 : index
    %c0_8 = arith.constant 0 : index
    %9 = vector.load %arg6[%c0_6, %c0_7, %c0_8] : memref<1x128x128xf32, #tpu.memory_space<vmem>>, vector<1x128x128xf32>
    %10 = vector.shape_cast %9 : vector<1x128x128xf32> to vector<128x128xf32>
    %11 = vector.shape_cast %8 : vector<128x128xf32> to vector<1x128x128xf32>
    tpu.vector_store %arg6[%c0_6, %c0_7, %c0_8], %11 {strides = array<i32>} : memref<1x128x128xf32, #tpu.memory_space<vmem>>, vector<1x128x128xf32>,
    return
  }
  func.func @transform_0(%arg0: i32, %arg1: i32, %arg2: i32) -> (i32, i32, i32) {
    %c0_i32 = arith.constant 0 : i32
    %c0_i32_0 = arith.constant 0 : i32
    %c0_i32_1 = arith.constant 0 : i32
    return %arg0, %c0_i32, %c0_i32_0 : i32, i32, i32
  }
  func.func @transform_1(%arg0: i32, %arg1: i32, %arg2: i32) -> (i32, i32) {
    %c0_i32 = arith.constant 0 : i32
    %c0_i32_0 = arith.constant 0 : i32
    return %c0_i32, %arg2 : i32, i32
  }
  func.func @transform_2(%arg0: i32, %arg1: i32, %arg2: i32) -> (i32, i32) {
    %c0_i32 = arith.constant 0 : i32
    %c0_i32_0 = arith.constant 0 : i32
    return %c0_i32, %arg2 : i32, i32
  }
  func.func @transform_3(%arg0: i32, %arg1: i32, %arg2: i32) -> (i32, i32, i32) {
    %c0_i32 = arith.constant 0 : i32
    return %arg0, %arg1, %arg2 : i32, i32, i32
  }
}

</mosaic_0001>

<bundles_post_ra>
// kernel: my_conv2d_forward.1
= control target key start
LH: loop header
LB: loop body
LE: loop exit
PB: predicated region body
PF: predicated region fallthrough
CT: control target
= control target key end

     0   :  { %s1457_s12 = smov 0   ;;  %s1459_s13 = smov 0   ;;  %s1805_s0 = inlined_call_operand.vmem [shape: bf16[2,296,4], index: 0, kind: input, shape index: {}]   ;;  %s1806_s1 = inlined_call_operand.vmem [shape: bf16[128,128], index: 1, kind: input, shape index: {}]   ;;  %s1807_s2 = inlined_call_operand.vmem [shape: f32[1,128], index: 2, kind: input, shape index: {}]   ;;  %s1808_s3 = inlined_call_operand.vmem [shape: f32[2,256,128], index: 3, kind: output, shape index: {}]  }
   0x1   :  { %s1461_s14 = smov 0   ;;  %s1463_s15 = smov 0  }
   0x2   :  { %s1465_s16 = smov 0  }
   0x3 LB: > { %s28_s17 = sadd.s32 1, %s1418_s14  ;;  %s32_s18 = sadd.s32 1, %s1422_s15  ;;  %s1426_s16 = sphi %s1465_s16, %s13_s16   ;;  %s1422_s15 = sphi %s1463_s15, %s1812_s15   ;;  %s1418_s14 = sphi %s1461_s14, %s1811_s14   ;;  %s1414_s13 = sphi %s1459_s13, %s1810_s13   ;;  %s1410_s12 = sphi %s1457_s12, %s1809_s12  }
   0x4   : > { %p30_p0 = scmp.ge.s32.totalorder %s28_s17, 2  ;;  %p1199_p1 = scmp.ge.s32.totalorder %s1426_s16, 1 }
   0x5   : > { %p177_p2 = scmp.lt.s32.totalorder %s1426_s16, 5 }
   0x6   : > { %s1814_s17 = smov (%p30_p0, %s28_s17), 0  ;;  %s1816_s18 = smov (!%p30_p0, %s32_s18), %s1422_s15 }
   0x7   : > { %p178_p3 = pnand %p1199_p1, %p177_p2  ;;  %p34_p4 = scmp.ge.s32.totalorder %s1816_s18, 2 }
   0x8   : > { %p215_p5 = scmp.lt.s32.totalorder (!%p178_p3), %s1414_s13, 1  ;;  %s1204_s19 = sshll.u32 (!%p178_p3), %s1410_s12, 7  ;;  %vm314_vm0 = vcmask (!%p178_p3), 1047840   ;;  %v1428_v0 = vmov (!%p178_p3), 0   ;;  %vm292_vm1 = vcmask (!%p178_p3), 31744   ;;  %vm411_vm2 = vcmask (!%p178_p3), 64544  }
   0x9   : > { %s1818_s18 = smov (%p34_p4, %s1816_s18), 0  ;;  %181 = sbr.rel (%p178_p3) target bundleno = 501 (0x1f5), region = 32 }
   0xa   : > { %s246_s20 = sshra.s32 (!%p178_p3), %s1204_s19, 3  ;;  %316 = vst.msk [vmem:[#allocation3 + $0x8] sm:$0xff] (!%p178_p3), %vm314_vm0, %v1428_v0  ;;  %315 = vst.msk [vmem:[#allocation3] sm:$0xff] (!%p178_p3), %vm314_vm0, %v1428_v0  ;;  %s1429_s27 = smov (!%p178_p3), 4   ;;  %vm476_vm3 = vcmask (!%p178_p3), 97344   ;;  %vm541_vm4 = vcmask (!%p178_p3), 130144  }
   0xb   : > { %s1205_s22 = sshll.u32 (!%p178_p3), %s246_s20, 2  ;;  %317 = vst.msk [vmem:[#allocation3 + $0x10] sm:$0xff] (!%p178_p3), %vm314_vm0, %v1428_v0  ;;  %318 = vst.msk [vmem:[#allocation3 + $0x18] sm:$0xff] (!%p178_p3), %vm314_vm0, %v1428_v0  ;;  %s1430_s28 = smov (!%p178_p3), 8   ;;  %vm606_vm5 = vcmask (!%p178_p3), 162944   ;;  %vm671_vm6 = vcmask (!%p178_p3), 195744  }
   0xc   : > { %319 = vst.msk [vmem:[#allocation3 + $0x20] sm:$0xff] (!%p178_p3), %vm314_vm0, %v1428_v0  ;;  %320 = vst.msk [vmem:[#allocation3 + $0x28] sm:$0xff] (!%p178_p3), %vm314_vm0, %v1428_v0  ;;  %s1431_s29 = smov (!%p178_p3), 12   ;;  %s1432_s30 = smov (!%p178_p3), 16   ;;  %vm736_vm7 = vcmask (!%p178_p3), 228544   ;;  %vm801_vm8 = vcmask (!%p178_p3), 261344  }
   0xd   : > { %321 = vst.msk [vmem:[#allocation3 + $0x30] sm:$0xff] (!%p178_p3), %vm314_vm0, %v1428_v0  ;;  %322 = vst.msk [vmem:[#allocation3 + $0x38] sm:$0xff] (!%p178_p3), %vm314_vm0, %v1428_v0  ;;  %s1433_s8 = smov (!%p178_p3), 20   ;;  %s1434_s20 = smov (!%p178_p3), 24   ;;  %vm866_vm9 = vcmask (!%p178_p3), 294144  }
   0xe   : > { %s1436_s7 = smov (!%p178_p3), 32  }
  0x10   : > { %s1820_s13 = smov (!%p215_p5, %s1414_s13), 1 }
  0x11   : > { %s1330_s21 = smul.u32 148, %s1820_s13 }
  0x13   : > { %s219_s25 = scalar_lea.vmem %s1805_s0, %s1330_s21 }
  0x14   : > { %s1496_s26 = scalar_lea.vmem %s219_s25, %s1205_s22  ;;  %s1435_s25 = smov 28  }
  0x15   : > { %v1257_v1 = vld [vmem:[%s1496_s26 + $0x8] sm:$0xff]   ;;  %v1258_v2 = vld [vmem:[%s1496_s26 + $0x10] sm:$0xff]   ;;  %v1218_v3 = vld [vmem:[%s1496_s26] sm:$0xff]  }
  0x16   : > { %v1223_v4 = vunpack.c.l.bf16 %v1257_v1  ;;  %v1224_v5 = vunpack.c.h.bf16 %v1257_v1  ;;  %v1227_v6 = vunpack.c.l.bf16 %v1258_v2  ;;  %v1228_v7 = vunpack.c.h.bf16 %v1258_v2  ;;  %v1261_v8 = vld [vmem:[%s1496_s26 + $0x28] sm:$0xff]   ;;  %v1262_v9 = vld [vmem:[%s1496_s26 + $0x30] sm:$0xff]   ;;  %v1260_v10 = vld [vmem:[%s1496_s26 + $0x20] sm:$0xff]  }
  0x17   : > { %v1219_v11 = vunpack.c.l.bf16 %v1218_v3  ;;  %v1220_v12 = vunpack.c.h.bf16 %v1218_v3  ;;  %v1239_v13 = vunpack.c.l.bf16 %v1261_v8  ;;  %v1240_v14 = vunpack.c.h.bf16 %v1261_v8  ;;  %v1263_v15 = vld [vmem:[%s1496_s26 + $0x38] sm:$0xff]   ;;  %v1264_v17 = vld [vmem:[%s1496_s26 + $0x40] sm:$0xff]   ;;  %v1265_v22 = vld [vmem:[%s1496_s26 + $0x48] sm:$0xff]  }
  0x18   : > { %v1259_v16 = vld [vmem:[%s1496_s26 + $0x18] sm:$0xff]   ;;  %295 = vst.msk [vmem:[#allocation2 + $0x10] sm:$0xff] %vm292_vm1, %v1223_v4  ;;  %296 = vst.msk [vmem:[#allocation2 + $0x18] sm:$0xff] %vm292_vm1, %v1224_v5  ;;  %v1243_v18 = vunpack.c.l.bf16 %v1262_v9  ;;  %v1235_v19 = vunpack.c.l.bf16 %v1260_v10  ;;  %v1236_v20 = vunpack.c.h.bf16 %v1260_v10  ;;  %v1244_v21 = vunpack.c.h.bf16 %v1262_v9  ;;  %v270_v23 = vld [vmem:[%s1496_s26 + $0x50] sm:$0xf] }
  0x19   : > { %297 = vst.msk [vmem:[#allocation2 + $0x20] sm:$0xff] %vm292_vm1, %v1227_v6  ;;  %298 = vst.msk [vmem:[#allocation2 + $0x28] sm:$0xff] %vm292_vm1, %v1228_v7  ;;  %v1247_v24 = vunpack.c.l.bf16 %v1263_v15  ;;  %v1231_v25 = vunpack.c.l.bf16 %v1259_v16  ;;  %v1248_v26 = vunpack.c.h.bf16 %v1263_v15  ;;  %v1232_v27 = vunpack.c.h.bf16 %v1259_v16 }
  0x1a   : > { %293 = vst.msk [vmem:[#allocation2] sm:$0xff] %vm292_vm1, %v1219_v11  ;;  %294 = vst.msk [vmem:[#allocation2 + $0x8] sm:$0xff] %vm292_vm1, %v1220_v12  ;;  %v1251_v28 = vunpack.c.l.bf16 %v1264_v17  ;;  %v1252_v29 = vunpack.c.h.bf16 %v1264_v17  ;;  %v1255_v30 = vunpack.c.l.bf16 %v1265_v22  ;;  %v1256_v31 = vunpack.c.h.bf16 %v1265_v22 }
  0x1b   : > { %303 = vst.msk [vmem:[#allocation2 + $0x50] sm:$0xff] %vm292_vm1, %v1239_v13  ;;  %304 = vst.msk [vmem:[#allocation2 + $0x58] sm:$0xff] %vm292_vm1, %v1240_v14  ;;  %v291_v32 = vunpack.c.l.bf16 %v270_v23  ;;  %v1380_v23 = vld [vmem:[%s1806_s1] sm:$0xff]  }
  0x1c   : > { %305 = vst.msk [vmem:[#allocation2 + $0x60] sm:$0xff] %vm292_vm1, %v1243_v18  ;;  %301 = vst.msk [vmem:[#allocation2 + $0x40] sm:$0xff] %vm292_vm1, %v1235_v19  ;;  %1282 = vmatprep.subr.bf16.mxu0 %v1380_v23  ;;  %1314 = vmatprep.subr.bf16.mxu1 %v1380_v23 }
  0x1d   : > { %302 = vst.msk [vmem:[#allocation2 + $0x48] sm:$0xff] %vm292_vm1, %v1236_v20  ;;  %306 = vst.msk [vmem:[#allocation2 + $0x68] sm:$0xff] %vm292_vm1, %v1244_v21  ;;  %1283 = vmatpush3.bf16.msra.mxu0 %v1380_v23  ;;  %1322 = vmatpush3.bf16.msra.mxu1 %v1380_v23 }
  0x1e   : > { %307 = vst.msk [vmem:[#allocation2 + $0x70] sm:$0xff] %vm292_vm1, %v1247_v24  ;;  %299 = vst.msk [vmem:[#allocation2 + $0x30] sm:$0xff] %vm292_vm1, %v1231_v25 }
  0x1f   : > { %308 = vst.msk [vmem:[#allocation2 + $0x78] sm:$0xff] %vm292_vm1, %v1248_v26  ;;  %300 = vst.msk [vmem:[#allocation2 + $0x38] sm:$0xff] %vm292_vm1, %v1232_v27  ;;  %v357_v33 = vld [vmem:[#allocation2 + $0x11] sm:$0xff] }
  0x20   : > { %309 = vst.msk [vmem:[#allocation2 + $0x80] sm:$0xff] %vm292_vm1, %v1251_v28  ;;  %310 = vst.msk [vmem:[#allocation2 + $0x88] sm:$0xff] %vm292_vm1, %v1252_v29  ;;  %v358_v34 = vld [vmem:[#allocation2 + $0x19] sm:$0xff]  ;;  %v485_v52 = vld [vmem:[#allocation2 + $0x10] sm:$0xff] }
  0x21   : > { %311 = vst.msk [vmem:[#allocation2 + $0x90] sm:$0xff] %vm292_vm1, %v1255_v30  ;;  %312 = vst.msk [vmem:[#allocation2 + $0x98] sm:$0xff] %vm292_vm1, %v1256_v31  ;;  %v1530_v35 = vpack.c.bf16 %v358_v34, %v357_v33  ;;  %v355_v36 = vld [vmem:[#allocation2 + $0x1] sm:$0xff]  ;;  %v356_v37 = vld [vmem:[#allocation2 + $0x9] sm:$0xff] }
  0x22   : > { %313 = vst.msk [vmem:[#allocation2 + $0xa0] sm:$0xff] %vm292_vm1, %v291_v32  ;;  %v365_v38 = vld [vmem:[#allocation2 + $0x51] sm:$0xff]  ;;  %v371_v39 = vpack.c.bf16 %v356_v37, %v355_v36  ;;  %v420_v47 = vld [vmem:[#allocation2 + $0x2] sm:$0xff]  ;;  %v423_v2 = vld [vmem:[#allocation2 + $0x1a] sm:$0xff] }
  0x23   : > { %v366_v40 = vld [vmem:[#allocation2 + $0x59] sm:$0xff]  ;;  %389 = vrot.lane.b32.xlu1 %v1530_v35, %s1429_s27  ;;  %v421_v48 = vld [vmem:[#allocation2 + $0xa] sm:$0xff]  ;;  %v552_v19 = vld [vmem:[#allocation2 + $0x21] sm:$0xff] }
  0x24   : > { %v363_v41 = vld [vmem:[#allocation2 + $0x41] sm:$0xff]  ;;  %v364_v42 = vld [vmem:[#allocation2 + $0x49] sm:$0xff]  ;;  %v1534_v43 = vpack.c.bf16 %v366_v40, %v365_v38  ;;  %387 = vrot.lane.b32.xlu0 %v371_v39, %s1429_s27  ;;  %v494_v50 = vld [vmem:[#allocation2 + $0x58] sm:$0xff]  ;;  %v436_v60 = vpack.c.bf16 %v421_v48, %v420_v47 }
  0x25   : > { %v1537_v44 = vpack.c.bf16 %v364_v42, %v363_v41  ;;  %v428_v45 = vld [vmem:[#allocation2 + $0x42] sm:$0xff]  ;;  %v429_v46 = vld [vmem:[#allocation2 + $0x4a] sm:$0xff]  ;;  %v486_v53 = vld [vmem:[#allocation2 + $0x18] sm:$0xff] }
  0x26   : > { %v493_v49 = vld [vmem:[#allocation2 + $0x50] sm:$0xff]  ;;  %v495_v54 = vld [vmem:[#allocation2 + $0x60] sm:$0xff]  ;;  %v1543_v55 = vpack.c.bf16 %v429_v46, %v428_v45  ;;  %v501_v56 = vpack.c.bf16 %v486_v53, %v485_v52  ;;  %v496_v57 = vld [vmem:[#allocation2 + $0x68] sm:$0xff] }
  0x27   : > { %v1539_v51 = vpack.c.bf16 %v494_v50, %v493_v49  ;;  %397 = vrot.lane.b32.xlu1 %v1534_v43, %s1429_s27  ;;  %v487_v58 = vld [vmem:[#allocation2 + $0x20] sm:$0xff]  ;;  %v488_v59 = vld [vmem:[#allocation2 + $0x28] sm:$0xff]  ;;  %v430_v61 = vld [vmem:[#allocation2 + $0x52] sm:$0xff]  ;;  %v1547_v63 = vpack.c.bf16 %v496_v57, %v495_v54 }
  0x28   : > { %395 = vrot.lane.b32.xlu0 %v1537_v44, %s1429_s27  ;;  %v431_v62 = vld [vmem:[#allocation2 + $0x5a] sm:$0xff]  ;;  %v1549_v0 = vpack.c.bf16 %v488_v59, %v487_v58  ;;  %v422_v1 = vld [vmem:[#allocation2 + $0x12] sm:$0xff]  ;;  %348 = vst.msk [vmem:[#allocation3 + $0x8] sm:$0xff] %vm292_vm1, %v501_v56  ;;  %v492_v12 = vld [vmem:[#allocation2 + $0x48] sm:$0xff] }
  0x29   : > { %352 = vst.msk [vmem:[#allocation3 + $0x28] sm:$0xff] %vm292_vm1, %v1539_v51  ;;  %v690_v3 = vld [vmem:[#allocation2 + $0x70] sm:$0xff]  ;;  %353 = vst.msk [vmem:[#allocation3 + $0x30] sm:$0xff] %vm292_vm1, %v1547_v63  ;;  %v1560_v4 = vpack.c.bf16 %v431_v62, %v430_v61  ;;  %v691_v5 = vld [vmem:[#allocation2 + $0x78] sm:$0xff]  ;;  %v437_v8 = vpack.c.bf16 %v423_v2, %v422_v1 }
  0x2a   : > { %349 = vst.msk [vmem:[#allocation3 + $0x10] sm:$0xff] %vm292_vm1, %v1549_v0  ;;  %v682_v6 = vld [vmem:[#allocation2 + $0x30] sm:$0xff]  ;;  %v683_v7 = vld [vmem:[#allocation2 + $0x38] sm:$0xff]  ;;  %v1563_v9 = vpack.c.bf16 %v691_v5, %v690_v3  ;;  %v491_v11 = vld [vmem:[#allocation2 + $0x40] sm:$0xff] }
  0x2b   : > { %460 = vrot.lane.b32.xlu1 %v1543_v55, %s1430_s28  ;;  %v1565_v10 = vpack.c.bf16 %v683_v7, %v682_v6  ;;  %v1574_v13 = vpack.c.bf16 %v492_v12, %v491_v11  ;;  %v324_v14 = vld [vmem:[#allocation2 + $0x8] sm:$0xff]  ;;  %v323_v15 = vld [vmem:[#allocation2] sm:$0xff]  ;;  %v1382_v31 = vld [vmem:[%s1806_s1 + $0x10] sm:$0xff]  }
  0x2c   : > { %452 = vrot.lane.b32.xlu0 %v436_v60, %s1430_s28  ;;  %354 = vst.msk [vmem:[#allocation3 + $0x38] sm:$0xff] %vm292_vm1, %v1563_v9  ;;  %v339_v16 = vpack.c.bf16 %v324_v14, %v323_v15  ;;  %v560_v17 = vld [vmem:[#allocation2 + $0x61] sm:$0xff]  ;;  %v561_v18 = vld [vmem:[#allocation2 + $0x69] sm:$0xff]  ;;  %v1383_v32 = vld [vmem:[%s1806_s1 + $0x18] sm:$0xff]  }
  0x2d   : > { %350 = vst.msk [vmem:[#allocation3 + $0x18] sm:$0xff] %vm292_vm1, %v1565_v10  ;;  %351 = vst.msk [vmem:[#allocation3 + $0x20] sm:$0xff] %vm292_vm1, %v1574_v13  ;;  %v553_v20 = vld [vmem:[#allocation2 + $0x29] sm:$0xff]  ;;  %v1588_v21 = vpack.c.bf16 %v561_v18, %v560_v17  ;;  %v1384_v33 = vld [vmem:[%s1806_s1 + $0x20] sm:$0xff]  }
  0x2e   : > { %347 = vst.msk [vmem:[#allocation3] sm:$0xff] %vm292_vm1, %v339_v16  ;;  %v1592_v22 = vpack.c.bf16 %v553_v20, %v552_v19  ;;  %v625_v24 = vld [vmem:[#allocation2 + $0x62] sm:$0xff]  ;;  %v626_v25 = vld [vmem:[#allocation2 + $0x6a] sm:$0xff]  ;;  %v748_v37 = vld [vmem:[#allocation2 + $0x39] sm:$0xff] }
  0x2f   : > { %462 = vrot.lane.b32.xlu1 %v1560_v4, %s1430_s28  ;;  %v617_v26 = vld [vmem:[#allocation2 + $0x22] sm:$0xff]  ;;  %v618_v27 = vld [vmem:[#allocation2 + $0x2a] sm:$0xff]  ;;  %v1606_v29 = vpack.c.bf16 %v626_v25, %v625_v24  ;;  %v1387_v42 = vld [vmem:[%s1806_s1 + $0x38] sm:$0xff]  }
  0x30   : > { %454 = vrot.lane.b32.xlu0 %v437_v8, %s1430_s28  ;;  %v1381_v28 = vld [vmem:[%s1806_s1 + $0x8] sm:$0xff]   ;;  %v1609_v30 = vpack.c.bf16 %v618_v27, %v617_v26  ;;  %v755_v34 = vld [vmem:[#allocation2 + $0x71] sm:$0xff]  ;;  %v821_v46 = vld [vmem:[#allocation2 + $0x7a] sm:$0xff] }
  0x31   : > { %1284 = vmatprep.subr.bf16.mxu0 %v1381_v28  ;;  %1315 = vmatprep.subr.bf16.mxu1 %v1381_v28  ;;  %v747_v36 = vld [vmem:[#allocation2 + $0x31] sm:$0xff]  ;;  %v1385_v38 = vld [vmem:[%s1806_s1 + $0x28] sm:$0xff]   ;;  %v813_v48 = vld [vmem:[#allocation2 + $0x3a] sm:$0xff] }
  0x32   : > { %1285 = vmatpush3.bf16.msra.mxu0 %v1381_v28  ;;  %1323 = vmatpush3.bf16.msra.mxu1 %v1381_v28  ;;  %v762_v40 = vpack.c.bf16 %v748_v37, %v747_v36  ;;  %v1386_v41 = vld [vmem:[%s1806_s1 + $0x30] sm:$0xff]   ;;  %v499_v52 = vld [vmem:[#allocation2 + $0x80] sm:$0xff]  ;;  %v500_v53 = vld [vmem:[#allocation2 + $0x88] sm:$0xff] }
  0x33   : > { %525 = vrot.lane.b32.xlu1 %v1539_v51, %s1431_s29  ;;  %1286 = vmatprep.subr.bf16.mxu0 %v1382_v31  ;;  %v820_v45 = vld [vmem:[#allocation2 + $0x72] sm:$0xff]  ;;  %v508_v54 = vpack.c.bf16 %v500_v53, %v499_v52  ;;  %v565_v57 = vld [vmem:[#allocation2 + $0x89] sm:$0xff]  ;;  %v825_v7 = vld [vmem:[#allocation2 + $0x9a] sm:$0xff] }
  0x34   : > { %517 = vrot.lane.b32.xlu0 %v501_v56, %s1431_s29  ;;  %1316 = vmatprep.subr.bf16.mxu1 %v1382_v31  ;;  %v812_v47 = vld [vmem:[#allocation2 + $0x32] sm:$0xff]  ;;  %v831_v49 = vpack.c.bf16 %v821_v46, %v820_v45  ;;  %v564_v56 = vld [vmem:[#allocation2 + $0x81] sm:$0xff]  ;;  %v630_v60 = vld [vmem:[#allocation2 + $0x8a] sm:$0xff] }
  0x35   : > { %v827_v50 = vpack.c.bf16 %v813_v48, %v812_v47  ;;  %v573_v58 = vpack.c.bf16 %v565_v57, %v564_v56  ;;  %v629_v59 = vld [vmem:[#allocation2 + $0x82] sm:$0xff]  ;;  %v694_v62 = vld [vmem:[#allocation2 + $0x90] sm:$0xff]  ;;  %v760_v2 = vld [vmem:[#allocation2 + $0x99] sm:$0xff] }
  0x36   : > { %1287 = vmatpush3.bf16.msra.mxu0 %v1382_v31  ;;  %1324 = vmatpush3.bf16.msra.mxu1 %v1382_v31  ;;  %v638_v61 = vpack.c.bf16 %v630_v60, %v629_v59  ;;  %v759_v1 = vld [vmem:[#allocation2 + $0x91] sm:$0xff] }
  0x37   : > { %527 = vrot.lane.b32.xlu1 %v1547_v63, %s1431_s29  ;;  %1288 = vmatprep.subr.bf16.mxu0 %v1383_v32  ;;  %v768_v3 = vpack.c.bf16 %v760_v2, %v759_v1 }
  0x38   : > { %519 = vrot.lane.b32.xlu0 %v1549_v0, %s1431_s29  ;;  %1317 = vmatprep.subr.bf16.mxu1 %v1383_v32 }
  0x3a   : > { %1289 = vmatpush3.bf16.msra.mxu0 %v1383_v32  ;;  %1325 = vmatpush3.bf16.msra.mxu1 %v1383_v32 }
  0x3b   : > { %590 = vrot.lane.b32.xlu1 %v1534_v43, %s1432_s30  ;;  %1290 = vmatprep.subr.bf16.mxu0 %v1384_v33 }
  0x3c   : > { %582 = vrot.lane.b32.xlu0 %v1530_v35, %s1432_s30  ;;  %v756_v35 = vld [vmem:[#allocation2 + $0x79] sm:$0xff]  ;;  %1318 = vmatprep.subr.bf16.mxu1 %v1384_v33 }
  0x3d   : > { %v766_v39 = vpack.c.bf16 %v756_v35, %v755_v34 }
  0x3e   : > { %1291 = vmatpush3.bf16.msra.mxu0 %v1384_v33  ;;  %1326 = vmatpush3.bf16.msra.mxu1 %v1384_v33 }
  0x3f   : > { %592 = vrot.lane.b32.xlu1 %v1588_v21, %s1432_s30  ;;  %1292 = vmatprep.subr.bf16.mxu0 %v1385_v38 }
  0x40   : > { %584 = vrot.lane.b32.xlu0 %v1592_v22, %s1432_s30  ;;  %1319 = vmatprep.subr.bf16.mxu1 %v1385_v38 }
  0x42   : > { %1293 = vmatpush3.bf16.msra.mxu0 %v1385_v38  ;;  %1327 = vmatpush3.bf16.msra.mxu1 %v1385_v38 }
  0x43   : > { %655 = vrot.lane.b32.xlu1 %v1560_v4, %s1433_s8  ;;  %1294 = vmatprep.subr.bf16.mxu0 %v1386_v41 }
  0x44   : > { %647 = vrot.lane.b32.xlu0 %v437_v8, %s1433_s8  ;;  %1320 = vmatprep.subr.bf16.mxu1 %v1386_v41 }
  0x46   : > { %1295 = vmatpush3.bf16.msra.mxu0 %v1386_v41  ;;  %1328 = vmatpush3.bf16.msra.mxu1 %v1386_v41 }
  0x47   : > { %657 = vrot.lane.b32.xlu1 %v1606_v29, %s1433_s8  ;;  %1296 = vmatprep.subr.bf16.mxu0 %v1387_v42 }
  0x48   : > { %649 = vrot.lane.b32.xlu0 %v1609_v30, %s1433_s8  ;;  %1321 = vmatprep.subr.bf16.mxu1 %v1387_v42 }
  0x4a   : > { %1297 = vmatpush3.bf16.msra.mxu0 %v1387_v42  ;;  %1329 = vmatpush3.bf16.msra.mxu1 %v1387_v42 }
  0x4b   : > { %720 = vrot.lane.b32.xlu1 %v1547_v63, %s1434_s20  ;;  %v695_v63 = vld [vmem:[#allocation2 + $0x98] sm:$0xff] }
  0x4c   : > { %712 = vrot.lane.b32.xlu0 %v1549_v0, %s1434_s20  ;;  %v703_v0 = vpack.c.bf16 %v695_v63, %v694_v62 }
  0x4f   : > { %722 = vrot.lane.b32.xlu1 %v1563_v9, %s1434_s20 }
  0x50   : > { %714 = vrot.lane.b32.xlu0 %v1565_v10, %s1434_s20 }
  0x53   : > { %785 = vrot.lane.b32.xlu1 %v1588_v21, %s1435_s25 }
  0x54   : > { %777 = vrot.lane.b32.xlu0 %v1592_v22, %s1435_s25 }
  0x57   : > { %787 = vrot.lane.b32.xlu1 %v766_v39, %s1435_s25 }
  0x58   : > { %779 = vrot.lane.b32.xlu0 %v762_v40, %s1435_s25 }
  0x5b   : > { %850 = vrot.lane.b32.xlu1 %v1606_v29, %s1436_s7 }
  0x5c   : > { %842 = vrot.lane.b32.xlu0 %v1609_v30, %s1436_s7 }
  0x5f   : > { %399 = vrot.lane.b32.xlu1 %v1588_v21, %s1429_s27 }
  0x60   : > { %391 = vrot.lane.b32.xlu0 %v1592_v22, %s1429_s27 }
  0x63   : > { %852 = vrot.lane.b32.xlu1 %v831_v49, %s1436_s7 }
  0x64   : > { %844 = vrot.lane.b32.xlu0 %v827_v50, %s1436_s7 }
  0x67   : > { %401 = vrot.lane.b32.xlu1 %v766_v39, %s1429_s27 }
  0x68   : > { %393 = vrot.lane.b32.xlu0 %v762_v40, %s1429_s27  ;;  %s1201_s27 = sshll.u32 %s1410_s12, 4 }
  0x69   : > { %p230_p6 = scmp.lt.s32.totalorder %s1201_s27, 31 }
  0x6b   : > { %464 = vrot.lane.b32.xlu1 %v1606_v29, %s1430_s28  ;;  %s1822_s27 = smov (!%p230_p6, %s1201_s27), 31 }
  0x6c   : > { %456 = vrot.lane.b32.xlu0 %v1609_v30, %s1430_s28 }
  0x6f   : > { %466 = vrot.lane.b32.xlu1 %v831_v49, %s1430_s28 }
  0x70   : > { %458 = vrot.lane.b32.xlu0 %v827_v50, %s1430_s28  ;;  %s1202_s28 = sshll.u32 %s1820_s13, 5 }
  0x73   : > { %529 = vrot.lane.b32.xlu1 %v1563_v9, %s1431_s29 }
  0x74   : > { %521 = vrot.lane.b32.xlu0 %v1565_v10, %s1431_s29 }
  0x77   : > { %531 = vrot.lane.b32.xlu1 %v508_v54, %s1431_s29 }
  0x78   : > { %523 = vrot.lane.b32.xlu0 %v1574_v13, %s1431_s29  ;;  %s236_s29 = sadd.s32 %s1202_s28, %s1822_s27 }
  0x7b   : > { %594 = vrot.lane.b32.xlu1 %v766_v39, %s1432_s30 }
  0x7c   : > { %586 = vrot.lane.b32.xlu0 %v762_v40, %s1432_s30 }
  0x7f   : > { %596 = vrot.lane.b32.xlu1 %v573_v58, %s1432_s30 }
  0x80   : > { %588 = vrot.lane.b32.xlu0 %v1537_v44, %s1432_s30  ;;  %s1203_s30 = sshll.u32 %s236_s29, 3 }
  0x81   : > { %s1772_s19 = scalar_lea.vmem %s1808_s3, %s1203_s30 }
  0x83   : > { %659 = vrot.lane.b32.xlu1 %v831_v49, %s1433_s8 }
  0x84   : > { %651 = vrot.lane.b32.xlu0 %v827_v50, %s1433_s8 }
  0x87   : > { %661 = vrot.lane.b32.xlu1 %v638_v61, %s1433_s8 }
  0x88   : > { %653 = vrot.lane.b32.xlu0 %v1543_v55, %s1433_s8 }
  0x8b   : > { %724 = vrot.lane.b32.xlu1 %v508_v54, %s1434_s20 }
  0x8c   : > { %716 = vrot.lane.b32.xlu0 %v1574_v13, %s1434_s20 }
  0x8f   : > { %726 = vrot.lane.b32.xlu1 %v703_v0, %s1434_s20 }
  0x90   : > { %718 = vrot.lane.b32.xlu0 %v1539_v51, %s1434_s20  ;;  %v824_v51 = vld [vmem:[#allocation2 + $0x92] sm:$0xff] }
  0x93   : > { %789 = vrot.lane.b32.xlu1 %v573_v58, %s1435_s25 }
  0x94   : > { %781 = vrot.lane.b32.xlu0 %v1537_v44, %s1435_s25  ;;  %v833_v44 = vpack.c.bf16 %v825_v7, %v824_v51 }
  0x95   : > { %v390_v5 = vpop.permute.xlu1 %389 }
  0x96   : > { %413 = vst.msk [vmem:[#allocation3 + $0x8] sm:$0xff] %vm411_vm2, %v390_v5  ;;  %v388_v6 = vpop.permute.xlu0 %387 }
  0x97   : > { %412 = vst.msk [vmem:[#allocation3] sm:$0xff] %vm411_vm2, %v388_v6  ;;  %791 = vrot.lane.b32.xlu1 %v768_v3, %s1435_s25 }
  0x98   : > { %783 = vrot.lane.b32.xlu0 %v1534_v43, %s1435_s25 }
  0x99   : > { %v398_v8 = vpop.permute.xlu1 %397 }
  0x9a   : > { %417 = vst.msk [vmem:[#allocation3 + $0x28] sm:$0xff] %vm411_vm2, %v398_v8  ;;  %v396_v9 = vpop.permute.xlu0 %395 }
  0x9b   : > { %416 = vst.msk [vmem:[#allocation3 + $0x20] sm:$0xff] %vm411_vm2, %v396_v9  ;;  %854 = vrot.lane.b32.xlu1 %v638_v61, %s1436_s7 }
  0x9c   : > { %846 = vrot.lane.b32.xlu0 %v1543_v55, %s1436_s7 }
  0x9d   : > { %v461_v10 = vpop.permute.xlu1 %460 }
  0x9e   : > { %481 = vst.msk [vmem:[#allocation3 + $0x20] sm:$0xff] %vm476_vm3, %v461_v10  ;;  %v453_v11 = vpop.permute.xlu0 %452 }
  0x9f   : > { %477 = vst.msk [vmem:[#allocation3] sm:$0xff] %vm476_vm3, %v453_v11  ;;  %856 = vrot.lane.b32.xlu1 %v833_v44, %s1436_s7 }
  0xa0   : > { %848 = vrot.lane.b32.xlu0 %v1560_v4, %s1436_s7 }
  0xa1   : > { %v463_v43 = vpop.permute.xlu1 %462 }
  0xa2   : > { %482 = vst.msk [vmem:[#allocation3 + $0x28] sm:$0xff] %vm476_vm3, %v463_v43  ;;  %v455_v12 = vpop.permute.xlu0 %454 }
  0xa3   : > { %478 = vst.msk [vmem:[#allocation3 + $0x8] sm:$0xff] %vm476_vm3, %v455_v12 }
  0xa5   : > { %v526_v13 = vpop.permute.xlu1 %525 }
  0xa6   : > { %546 = vst.msk [vmem:[#allocation3 + $0x20] sm:$0xff] %vm541_vm4, %v526_v13  ;;  %v518_v55 = vpop.permute.xlu0 %517  ;;  %v1206_v13 = vld [vmem:[%s1807_s2] ss:$0 sm:$0xff] }
  0xa7   : > { %542 = vst.msk [vmem:[#allocation3] sm:$0xff] %vm541_vm4, %v518_v55 }
  0xa9   : > { %v528_v14 = vpop.permute.xlu1 %527 }
  0xaa   : > { %547 = vst.msk [vmem:[#allocation3 + $0x28] sm:$0xff] %vm541_vm4, %v528_v14  ;;  %v520_v15 = vpop.permute.xlu0 %519 }
  0xab   : > { %543 = vst.msk [vmem:[#allocation3 + $0x8] sm:$0xff] %vm541_vm4, %v520_v15 }
  0xad   : > { %v591_v4 = vpop.permute.xlu1 %590 }
  0xae   : > { %611 = vst.msk [vmem:[#allocation3 + $0x20] sm:$0xff] %vm606_vm5, %v591_v4  ;;  %v583_v16 = vpop.permute.xlu0 %582 }
  0xaf   : > { %607 = vst.msk [vmem:[#allocation3] sm:$0xff] %vm606_vm5, %v583_v16 }
  0xb1   : > { %v593_v17 = vpop.permute.xlu1 %592 }
  0xb2   : > { %612 = vst.msk [vmem:[#allocation3 + $0x28] sm:$0xff] %vm606_vm5, %v593_v17  ;;  %v585_v18 = vpop.permute.xlu0 %584 }
  0xb3   : > { %608 = vst.msk [vmem:[#allocation3 + $0x8] sm:$0xff] %vm606_vm5, %v585_v18 }
  0xb5   : > { %v656_v19 = vpop.permute.xlu1 %655 }
  0xb6   : > { %676 = vst.msk [vmem:[#allocation3 + $0x20] sm:$0xff] %vm671_vm6, %v656_v19  ;;  %v648_v20 = vpop.permute.xlu0 %647 }
  0xb7   : > { %672 = vst.msk [vmem:[#allocation3] sm:$0xff] %vm671_vm6, %v648_v20 }
  0xb9   : > { %v658_v21 = vpop.permute.xlu1 %657 }
  0xba   : > { %677 = vst.msk [vmem:[#allocation3 + $0x28] sm:$0xff] %vm671_vm6, %v658_v21  ;;  %v650_v22 = vpop.permute.xlu0 %649 }
  0xbb   : > { %673 = vst.msk [vmem:[#allocation3 + $0x8] sm:$0xff] %vm671_vm6, %v650_v22 }
  0xbd   : > { %v721_v23 = vpop.permute.xlu1 %720 }
  0xbe   : > { %741 = vst.msk [vmem:[#allocation3 + $0x20] sm:$0xff] %vm736_vm7, %v721_v23  ;;  %v713_v24 = vpop.permute.xlu0 %712 }
  0xbf   : > { %737 = vst.msk [vmem:[#allocation3] sm:$0xff] %vm736_vm7, %v713_v24 }
  0xc1   : > { %v723_v25 = vpop.permute.xlu1 %722 }
  0xc2   : > { %742 = vst.msk [vmem:[#allocation3 + $0x28] sm:$0xff] %vm736_vm7, %v723_v25  ;;  %v715_v26 = vpop.permute.xlu0 %714 }
  0xc3   : > { %738 = vst.msk [vmem:[#allocation3 + $0x8] sm:$0xff] %vm736_vm7, %v715_v26 }
  0xc5   : > { %v786_v27 = vpop.permute.xlu1 %785 }
  0xc6   : > { %806 = vst.msk [vmem:[#allocation3 + $0x20] sm:$0xff] %vm801_vm8, %v786_v27  ;;  %v778_v28 = vpop.permute.xlu0 %777 }
  0xc7   : > { %802 = vst.msk [vmem:[#allocation3] sm:$0xff] %vm801_vm8, %v778_v28 }
  0xc9   : > { %v788_v29 = vpop.permute.xlu1 %787 }
  0xca   : > { %807 = vst.msk [vmem:[#allocation3 + $0x28] sm:$0xff] %vm801_vm8, %v788_v29  ;;  %v780_v30 = vpop.permute.xlu0 %779 }
  0xcb   : > { %803 = vst.msk [vmem:[#allocation3 + $0x8] sm:$0xff] %vm801_vm8, %v780_v30 }
  0xcd   : > { %v851_v31 = vpop.permute.xlu1 %850 }
  0xce   : > { %871 = vst.msk [vmem:[#allocation3 + $0x20] sm:$0xff] %vm866_vm9, %v851_v31  ;;  %v843_v32 = vpop.permute.xlu0 %842 }
  0xcf   : > { %867 = vst.msk [vmem:[#allocation3] sm:$0xff] %vm866_vm9, %v843_v32 }
  0xd1   : > { %v400_v33 = vpop.permute.xlu1 %399 }
  0xd2   : > { %418 = vst.msk [vmem:[#allocation3 + $0x30] sm:$0xff] %vm411_vm2, %v400_v33  ;;  %v392_v34 = vpop.permute.xlu0 %391 }
  0xd3   : > { %414 = vst.msk [vmem:[#allocation3 + $0x10] sm:$0xff] %vm411_vm2, %v392_v34 }
  0xd5   : > { %v853_v35 = vpop.permute.xlu1 %852  ;;  %v879_v36 = vld [vmem:[#allocation3 + $0x20] sm:$0xff] }
  0xd6   : > { %872 = vst.msk [vmem:[#allocation3 + $0x28] sm:$0xff] %vm866_vm9, %v853_v35  ;;  %v845_v37 = vpop.permute.xlu0 %844  ;;  %v875_v38 = vld [vmem:[#allocation3] sm:$0xff]  ;;  %1306 = vmatprep.mubr.bf16.mxu1 %v879_v36 }
  0xd7   : > { %868 = vst.msk [vmem:[#allocation3 + $0x8] sm:$0xff] %vm866_vm9, %v845_v37  ;;  %1298 = vmatprep.mubr.bf16.mxu0 %v875_v38 }
  0xd9   : > { %v402_v39 = vpop.permute.xlu1 %401 }
  0xda   : > { %419 = vst.msk [vmem:[#allocation3 + $0x38] sm:$0xff] %vm411_vm2, %v402_v39  ;;  %v394_v40 = vpop.permute.xlu0 %393 }
  0xdb   : > { %415 = vst.msk [vmem:[#allocation3 + $0x18] sm:$0xff] %vm411_vm2, %v394_v40 }
  0xdd   : > { %v465_v41 = vpop.permute.xlu1 %464  ;;  %v880_v42 = vld [vmem:[#allocation3 + $0x28] sm:$0xff] }
  0xde   : > { %483 = vst.msk [vmem:[#allocation3 + $0x30] sm:$0xff] %vm476_vm3, %v465_v41  ;;  %v457_v45 = vpop.permute.xlu0 %456  ;;  %v876_v46 = vld [vmem:[#allocation3 + $0x8] sm:$0xff]  ;;  %1307 = vmatmul.mubr.bf16.vlgmr.msra.gmra.mrb[0].mxu1 %v880_v42 }
  0xdf   : > { %479 = vst.msk [vmem:[#allocation3 + $0x10] sm:$0xff] %vm476_vm3, %v457_v45  ;;  %1299 = vmatmul.mubr.bf16.vlgmr.msra.gmra.mrb[0].mxu0 %v876_v46 }
  0xe1   : > { %v467_v47 = vpop.permute.xlu1 %466 }
  0xe2   : > { %484 = vst.msk [vmem:[#allocation3 + $0x38] sm:$0xff] %vm476_vm3, %v467_v47  ;;  %v459_v48 = vpop.permute.xlu0 %458 }
  0xe3   : > { %480 = vst.msk [vmem:[#allocation3 + $0x18] sm:$0xff] %vm476_vm3, %v459_v48 }
  0xe5   : > { %v530_v49 = vpop.permute.xlu1 %529 }
  0xe6   : > { %548 = vst.msk [vmem:[#allocation3 + $0x30] sm:$0xff] %vm541_vm4, %v530_v49  ;;  %v522_v50 = vpop.permute.xlu0 %521 }
  0xe7   : > { %544 = vst.msk [vmem:[#allocation3 + $0x10] sm:$0xff] %vm541_vm4, %v522_v50 }
  0xe9   : > { %v532_v52 = vpop.permute.xlu1 %531 }
  0xea   : > { %549 = vst.msk [vmem:[#allocation3 + $0x38] sm:$0xff] %vm541_vm4, %v532_v52  ;;  %v524_v53 = vpop.permute.xlu0 %523 }
  0xeb   : > { %545 = vst.msk [vmem:[#allocation3 + $0x18] sm:$0xff] %vm541_vm4, %v524_v53 }
  0xed   : > { %v595_v54 = vpop.permute.xlu1 %594 }
  0xee   : > { %613 = vst.msk [vmem:[#allocation3 + $0x30] sm:$0xff] %vm606_vm5, %v595_v54  ;;  %v587_v56 = vpop.permute.xlu0 %586 }
  0xef   : > { %609 = vst.msk [vmem:[#allocation3 + $0x10] sm:$0xff] %vm606_vm5, %v587_v56 }
  0xf1   : > { %v597_v57 = vpop.permute.xlu1 %596 }
  0xf2   : > { %614 = vst.msk [vmem:[#allocation3 + $0x38] sm:$0xff] %vm606_vm5, %v597_v57  ;;  %v589_v58 = vpop.permute.xlu0 %588 }
  0xf3   : > { %610 = vst.msk [vmem:[#allocation3 + $0x18] sm:$0xff] %vm606_vm5, %v589_v58 }
  0xf5   : > { %v660_v59 = vpop.permute.xlu1 %659 }
  0xf6   : > { %678 = vst.msk [vmem:[#allocation3 + $0x30] sm:$0xff] %vm671_vm6, %v660_v59  ;;  %v652_v60 = vpop.permute.xlu0 %651 }
  0xf7   : > { %674 = vst.msk [vmem:[#allocation3 + $0x10] sm:$0xff] %vm671_vm6, %v652_v60 }
  0xf9   : > { %v662_v61 = vpop.permute.xlu1 %661 }
  0xfa   : > { %679 = vst.msk [vmem:[#allocation3 + $0x38] sm:$0xff] %vm671_vm6, %v662_v61  ;;  %v654_v62 = vpop.permute.xlu0 %653 }
  0xfb   : > { %675 = vst.msk [vmem:[#allocation3 + $0x18] sm:$0xff] %vm671_vm6, %v654_v62 }
  0xfd   : > { %v725_v63 = vpop.permute.xlu1 %724 }
  0xfe   : > { %743 = vst.msk [vmem:[#allocation3 + $0x30] sm:$0xff] %vm736_vm7, %v725_v63  ;;  %v717_v0 = vpop.permute.xlu0 %716 }
  0xff   : > { %739 = vst.msk [vmem:[#allocation3 + $0x10] sm:$0xff] %vm736_vm7, %v717_v0 }
 0x101   : > { %v727_v1 = vpop.permute.xlu1 %726 }
 0x102   : > { %744 = vst.msk [vmem:[#allocation3 + $0x38] sm:$0xff] %vm736_vm7, %v727_v1  ;;  %v719_v2 = vpop.permute.xlu0 %718 }
 0x103   : > { %740 = vst.msk [vmem:[#allocation3 + $0x18] sm:$0xff] %vm736_vm7, %v719_v2 }
 0x105   : > { %v790_v3 = vpop.permute.xlu1 %789 }
 0x106   : > { %808 = vst.msk [vmem:[#allocation3 + $0x30] sm:$0xff] %vm801_vm8, %v790_v3  ;;  %v782_v5 = vpop.permute.xlu0 %781 }
 0x107   : > { %804 = vst.msk [vmem:[#allocation3 + $0x10] sm:$0xff] %vm801_vm8, %v782_v5 }
 0x109   : > { %v792_v6 = vpop.permute.xlu1 %791 }
 0x10a   : > { %809 = vst.msk [vmem:[#allocation3 + $0x38] sm:$0xff] %vm801_vm8, %v792_v6  ;;  %v784_v51 = vpop.permute.xlu0 %783 }
 0x10b   : > { %805 = vst.msk [vmem:[#allocation3 + $0x18] sm:$0xff] %vm801_vm8, %v784_v51 }
 0x10d   : > { %v855_v7 = vpop.permute.xlu1 %854 }
 0x10e   : > { %873 = vst.msk [vmem:[#allocation3 + $0x30] sm:$0xff] %vm866_vm9, %v855_v7  ;;  %v847_v8 = vpop.permute.xlu0 %846 }
 0x10f   : > { %869 = vst.msk [vmem:[#allocation3 + $0x10] sm:$0xff] %vm866_vm9, %v847_v8 }
 0x111   : > { %v857_v9 = vpop.permute.xlu1 %856 }
 0x112   : > { %874 = vst.msk [vmem:[#allocation3 + $0x38] sm:$0xff] %vm866_vm9, %v857_v9  ;;  %v849_v44 = vpop.permute.xlu0 %848 }
 0x113   : > { %870 = vst.msk [vmem:[#allocation3 + $0x18] sm:$0xff] %vm866_vm9, %v849_v44 }
 0x115   : > { %v881_v10 = vld [vmem:[#allocation3 + $0x30] sm:$0xff] }
 0x116   : > { %v877_v11 = vld [vmem:[#allocation3 + $0x10] sm:$0xff]  ;;  %1310 = vmatprep.mubr.bf16.mxu1 %v881_v10 }
 0x117   : > { %1302 = vmatprep.mubr.bf16.mxu0 %v877_v11 }
 0x119   : > { %v882_v43 = vld [vmem:[#allocation3 + $0x38] sm:$0xff] }
 0x11a   : > { %v878_v12 = vld [vmem:[#allocation3 + $0x18] sm:$0xff]  ;;  %1311 = vmatmul.mubr.bf16.gmra.mrb[4].mxu1 %v882_v43 }
 0x11b   : > { %1303 = vmatmul.mubr.bf16.gmra.mrb[4].mxu0 %v878_v12 }
 0x1b1   : > { %v1308_v55 = vpop.f32.mrb[0].mxu1 }
 0x1b2   : > { %v1300_v14 = vpop.f32.mrb[0].mxu0  ;;  %v1029_v15 = vadd.f32 %v1308_v55, %v1206_v13  ;;  %v1020_v4 = vpop.f32.mrb[1].mxu1 }
 0x1b3   : > { %v997_v16 = vadd.f32 %v1300_v14, %v1206_v13  ;;  %v988_v17 = vpop.f32.mrb[1].mxu0  ;;  %v1021_v18 = vadd.f32 %v1206_v13, %v1020_v4  ;;  %v1309_v19 = vpop.f32.mrb[2].mxu1 }
 0x1b4   : > { %1061 = vst [vmem:[%s1772_s19 + $0x50] sm:$0xff] %v1029_v15  ;;  %v989_v20 = vadd.f32 %v1206_v13, %v988_v17  ;;  %v1301_v21 = vpop.f32.mrb[2].mxu0  ;;  %v1032_v22 = vadd.f32 %v1309_v19, %v1206_v13  ;;  %v1023_v23 = vpop.f32.mrb[3].mxu1 }
 0x1b5   : > { %1053 = vst [vmem:[%s1772_s19 + $0x10] sm:$0xff] %v997_v16  ;;  %1059 = vst [vmem:[%s1772_s19 + $0x40] sm:$0xff] %v1021_v18  ;;  %v1000_v24 = vadd.f32 %v1301_v21, %v1206_v13  ;;  %v991_v25 = vpop.f32.mrb[3].mxu0  ;;  %v1024_v26 = vadd.f32 %v1206_v13, %v1023_v23 }
 0x1b6   : > { %1051 = vst [vmem:[%s1772_s19] sm:$0xff] %v989_v20  ;;  %1062 = vst [vmem:[%s1772_s19 + $0x58] sm:$0xff] %v1032_v22  ;;  %v992_v27 = vadd.f32 %v1206_v13, %v991_v25 }
 0x1b7   : > { %1054 = vst [vmem:[%s1772_s19 + $0x18] sm:$0xff] %v1000_v24  ;;  %1060 = vst [vmem:[%s1772_s19 + $0x48] sm:$0xff] %v1024_v26 }
 0x1b8   : > { %1052 = vst [vmem:[%s1772_s19 + $0x8] sm:$0xff] %v992_v27 }
 0x1ed   : > { %v1312_v28 = vpop.f32.mrb[4].mxu1 }
 0x1ee   : > { %v1304_v29 = vpop.f32.mrb[4].mxu0  ;;  %v1045_v30 = vadd.f32 %v1312_v28, %v1206_v13  ;;  %v1036_v31 = vpop.f32.mrb[5].mxu1 }
 0x1ef   : > { %v1013_v32 = vadd.f32 %v1304_v29, %v1206_v13  ;;  %v1004_v33 = vpop.f32.mrb[5].mxu0  ;;  %v1037_v34 = vadd.f32 %v1206_v13, %v1036_v31  ;;  %v1313_v35 = vpop.f32.mrb[6].mxu1 }
 0x1f0   : > { %1065 = vst [vmem:[%s1772_s19 + $0x70] sm:$0xff] %v1045_v30  ;;  %v1005_v36 = vadd.f32 %v1206_v13, %v1004_v33  ;;  %v1305_v37 = vpop.f32.mrb[6].mxu0  ;;  %v1048_v38 = vadd.f32 %v1313_v35, %v1206_v13  ;;  %v1039_v39 = vpop.f32.mrb[7].mxu1 }
 0x1f1   : > { %1057 = vst [vmem:[%s1772_s19 + $0x30] sm:$0xff] %v1013_v32  ;;  %1063 = vst [vmem:[%s1772_s19 + $0x60] sm:$0xff] %v1037_v34  ;;  %v1016_v40 = vadd.f32 %v1305_v37, %v1206_v13  ;;  %v1007_v41 = vpop.f32.mrb[7].mxu0  ;;  %v1040_v42 = vadd.f32 %v1206_v13, %v1039_v39 }
 0x1f2   : > { %1055 = vst [vmem:[%s1772_s19 + $0x20] sm:$0xff] %v1005_v36  ;;  %1066 = vst [vmem:[%s1772_s19 + $0x78] sm:$0xff] %v1048_v38  ;;  %v1008_v45 = vadd.f32 %v1206_v13, %v1007_v41 }
 0x1f3   : > { %1058 = vst [vmem:[%s1772_s19 + $0x38] sm:$0xff] %v1016_v40  ;;  %1064 = vst [vmem:[%s1772_s19 + $0x68] sm:$0xff] %v1040_v42 }
 0x1f4   : > { %1056 = vst [vmem:[%s1772_s19 + $0x28] sm:$0xff] %v1008_v45 }
 0x1f5 PF: > { %s13_s16 = sadd.s32 1, %s1426_s16   ;;  %s1809_s12 = smov %s1418_s14 }
 0x1f6   : > { %p10_p7 = scmp.ge.s32.totalorder %s13_s16, 6   ;;  %s1810_s13 = smov %s1422_s15 }
 0x1f7   : > { %s1811_s14 = smov %s1814_s17  ;;  %s1812_s15 = smov %s1818_s18 }
 0x1f8   :  { %12 = sbr.rel (!%p10_p7) target bundleno = 3 (0x3), region = 73 }

</bundles_post_ra>
